<compile_context>
chip_gen: v7x
topology: tpu7x:2x2x1
jax: 0.10.0
libtpu: 0.0.40
codegen_flags: <defaults>
</compile_context>

<pallas_src>
import jax
import jax.numpy as jnp
from jax.experimental import pallas as pl
from jax.experimental.pallas import tpu as pltpu

IN_FEATURES = 28 * 28   # 784
OUT_FEATURES = 10


def _cdiv(a: int, b: int) -> int:
    return -(-a // b)


def _round_up(x: int, m: int) -> int:
    return _cdiv(x, m) * m


def netlin_kernel(x_ref, w_ref, b_ref, o_ref):
    # x_ref: (TILE_B, 784) f32   w_ref: (784, 10) f32
    # b_ref: (1, 10) f32         o_ref: (TILE_B, 10) f32
    logits = jnp.dot(
        x_ref[...], w_ref[...], preferred_element_type=jnp.float32
    ) + b_ref[...]                                    # (TILE_B, 10) f32

    # numerically-stable log_softmax along the class axis (dim=1), in f32
    m = jnp.max(logits, axis=-1, keepdims=True)       # (TILE_B, 1)
    shifted = logits - m
    lse = jnp.log(jnp.sum(jnp.exp(shifted), axis=-1, keepdims=True))
    o_ref[...] = (shifted - lse).astype(o_ref.dtype)


def netlin_forward(x_nchw, weight_oi, bias_o, *, tile_b: int = 4096):
    """x_nchw: (B, 1, 28, 28) float32; weight_oi: (10, 784); bias_o: (10,)."""
    B = x_nchw.shape[0]

    # Flatten (matches x.view(B, -1)); contiguous reshape, no extra HBM pass.
    x_flat = x_nchw.reshape(B, IN_FEATURES).astype(jnp.float32)    # (B, 784)
    w_io = weight_oi.T.astype(jnp.float32)                         # (784, 10)
    b = bias_o.reshape(1, OUT_FEATURES).astype(jnp.float32)        # (1, 10)

    # Tile: multiple of 8 sublanes, capped at ceil(B/2) so the grid has >= 2
    # steps when possible (lets v7x's two TensorCores split the batch axis),
    # and capped at tile_b so double-buffered f32 blocks fit VMEM everywhere.
    tile = min(tile_b, _round_up(_cdiv(B, 2), 8))
    grid = (_cdiv(B, tile),)   # ragged last block handled by Pallas (clipped)

    out = pl.pallas_call(
        netlin_kernel,
        out_shape=jax.ShapeDtypeStruct((B, OUT_FEATURES), jnp.float32),
        grid=grid,
        in_specs=[
            # x: streamed per grid step (double-buffered DMA overlaps compute)
            pl.BlockSpec((tile, IN_FEATURES), lambda i: (i, 0)),
            # weight / bias: same block every step -> stay resident in VMEM
            pl.BlockSpec((IN_FEATURES, OUT_FEATURES), lambda i: (0, 0)),
            pl.BlockSpec((1, OUT_FEATURES), lambda i: (0, 0)),
        ],
        out_specs=pl.BlockSpec((tile, OUT_FEATURES), lambda i: (i, 0)),
        compiler_params=pltpu.CompilerParams(
            dimension_semantics=("parallel",),   # 2x on v7x (2 TCs); no-op elsewhere
            vmem_limit_bytes=48 << 20,
        ),
    )(x_flat, w_io, b)

    return out


if __name__ == "__main__":
    key = jax.random.PRNGKey(0)
    k_x, k_w, k_b = jax.random.split(key, 3)

    # Deterministic parameter init (mimics nn.Linear's U(-1/sqrt(in), 1/sqrt(in)))
    bound = 1.0 / (IN_FEATURES ** 0.5)
    weight = jax.random.uniform(
        k_w, (OUT_FEATURES, IN_FEATURES), jnp.float32, -bound, bound
    )
    bias = jax.random.uniform(
        k_b, (OUT_FEATURES,), jnp.float32, -bound, bound
    )

    # Small example input consistent with the module: MNIST-like NCHW batch.
    B = 2
    x = jax.random.normal(k_x, (B, 1, 28, 28), jnp.float32)

    out = netlin_forward(x, weight, bias)
    out = jax.block_until_ready(out)

    # sanity 1: shape + log_softmax rows must exp-sum to 1 (valid rows only)
    assert out.shape == (B, OUT_FEATURES)
    row_sums = jnp.exp(out).sum(axis=1)
    assert bool(jnp.all(jnp.abs(row_sums - 1.0) < 1e-4))

    # sanity 2: match a pure-JAX f32 reference
    x_flat_f32 = x.reshape(B, IN_FEATURES)
    ref = jax.nn.log_softmax(x_flat_f32 @ weight.T + bias, axis=-1)
    assert bool(jnp.max(jnp.abs(out - ref)) < 1e-2)

    print("KERNEL_OK")
</pallas_src>

<mosaic_0001>
module attributes {stable_mosaic.version = 11 : i64} {
  func.func @netlin_kernel(%arg0: i32, %arg1: memref<8x784xf32, #tpu.memory_space<vmem>>, %arg2: memref<784x10xf32, #tpu.memory_space<vmem>>, %arg3: memref<1x10xf32, #tpu.memory_space<vmem>>, %arg4: memref<8x10xf32, #tpu.memory_space<vmem>>) attributes {dimension_semantics = [#tpu.dimension_semantics<parallel>], iteration_bounds = array<i64: 1>, scalar_prefetch = 0 : i64, scratch_operands = 0 : i64, tpu.core_type = #tpu.core_type<tc>, window_params = [{transform_indices = @transform_0, window_bounds = array<i64: 8, 784>}, {pipeline_mode = #tpu.pipeline_mode<synchronous>, transform_indices = @transform_1, window_bounds = array<i64: 784, 10>}, {pipeline_mode = #tpu.pipeline_mode<synchronous>, transform_indices = @transform_2, window_bounds = array<i64: 1, 10>}, {transform_indices = @transform_3, window_bounds = array<i64: 8, 10>}]} {
    %c0 = arith.constant 0 : index
    %c0_0 = arith.constant 0 : index
    %0 = vector.load %arg1[%c0, %c0_0] : memref<8x784xf32, #tpu.memory_space<vmem>>, vector<8x784xf32>
    %c0_1 = arith.constant 0 : index
    %c0_2 = arith.constant 0 : index
    %1 = vector.load %arg2[%c0_1, %c0_2] : memref<784x10xf32, #tpu.memory_space<vmem>>, vector<784x10xf32>
    %cst = arith.constant dense<0.000000e+00> : vector<8x10xf32>
    %2 = tpu.matmul %0, %1, %cst {dimension_numbers = #tpu.dot_dimension_numbers<[1], [0], [0], [1], [0, 0, 1, 1], [], []>} : vector<8x784xf32>, vector<784x10xf32>, vector<8x10xf32> -> vector<8x10xf32>
    %c0_3 = arith.constant 0 : index
    %c0_4 = arith.constant 0 : index
    %3 = vector.load %arg3[%c0_3, %c0_4] : memref<1x10xf32, #tpu.memory_space<vmem>>, vector<1x10xf32>
    %4 = vector.broadcast %3 : vector<1x10xf32> to vector<8x10xf32>
    %5 = arith.addf %2, %4 : vector<8x10xf32>
    %cst_5 = arith.constant dense<0xFF800000> : vector<8xf32>
    %6 = vector.multi_reduction <maximumf>, %5, %cst_5 [1] : vector<8x10xf32> to vector<8xf32>
    %7 = vector.shape_cast %6 : vector<8xf32> to vector<8x1xf32>
    %8 = vector.broadcast %7 : vector<8x1xf32> to vector<8x10xf32>
    %9 = arith.subf %5, %8 : vector<8x10xf32>
    %10 = math.exp %9 : vector<8x10xf32>
    %cst_6 = arith.constant dense<0.000000e+00> : vector<8xf32>
    %11 = vector.multi_reduction <add>, %10, %cst_6 [1] : vector<8x10xf32> to vector<8xf32>
    %12 = vector.shape_cast %11 : vector<8xf32> to vector<8x1xf32>
    %13 = math.log %12 : vector<8x1xf32>
    %14 = vector.broadcast %13 : vector<8x1xf32> to vector<8x10xf32>
    %15 = arith.subf %9, %14 : vector<8x10xf32>
    %c0_7 = arith.constant 0 : index
    %c0_8 = arith.constant 0 : index
    %16 = vector.load %arg4[%c0_7, %c0_8] : memref<8x10xf32, #tpu.memory_space<vmem>>, vector<8x10xf32>
    tpu.vector_store %arg4[%c0_7, %c0_8], %15 {strides = array<i32>} : memref<8x10xf32, #tpu.memory_space<vmem>>, vector<8x10xf32>,
    return
  }
  func.func @transform_0(%arg0: i32) -> (i32, i32) {
    %c0_i32 = arith.constant 0 : i32
    %c0_i32_0 = arith.constant 0 : i32
    return %arg0, %c0_i32 : i32, i32
  }
  func.func @transform_1(%arg0: i32) -> (i32, i32) {
    %c0_i32 = arith.constant 0 : i32
    %c0_i32_0 = arith.constant 0 : i32
    %c0_i32_1 = arith.constant 0 : i32
    return %c0_i32, %c0_i32_0 : i32, i32
  }
  func.func @transform_2(%arg0: i32) -> (i32, i32) {
    %c0_i32 = arith.constant 0 : i32
    %c0_i32_0 = arith.constant 0 : i32
    %c0_i32_1 = arith.constant 0 : i32
    return %c0_i32, %c0_i32_0 : i32, i32
  }
  func.func @transform_3(%arg0: i32) -> (i32, i32) {
    %c0_i32 = arith.constant 0 : i32
    %c0_i32_0 = arith.constant 0 : i32
    return %arg0, %c0_i32 : i32, i32
  }
}

</mosaic_0001>

<bundles_post_ra>
// kernel: tpu_custom_call.1
= control target key start
LH: loop header
LB: loop body
LE: loop exit
PB: predicated region body
PF: predicated region fallthrough
CT: control target
= control target key end

     0   :  { %8 = vsyncpa [#allocation3], 0  ;;  %v789_v51 = vmov 1983009808   ;;  %v143_v53 = vlaneseq  ;;  %vm791_vm0 = vmmov 0   ;;  %vm213_vm1 = vcmask 130048   ;;  %s1162_s0 = inlined_call_operand.vmem [shape: f32[2,784], index: 0, kind: input, shape index: {}]   ;;  %s1163_s1 = inlined_call_operand.vmem [shape: f32[784,10], index: 1, kind: input, shape index: {}]   ;;  %s1164_s2 = inlined_call_operand.vmem [shape: f32[1,10], index: 2, kind: input, shape index: {}]   ;;  %s1165_s3 = inlined_call_operand.hbm [shape: f32[2,10], index: 3, kind: output, shape index: {}]  }
   0x1   :  { %v39_v0 = vld [vmem:[%s1163_s1 + $0x80] sm:$0xff]  ;;  %v40_v1 = vld [vmem:[%s1163_s1 + $0x88] sm:$0xff]  ;;  %v41_v12 = vld [vmem:[%s1163_s1 + $0x90] sm:$0xff]  ;;  %v141_v52 = vunpack.c.l.s4 %v789_v51  ;;  %vm496_vm2 = vcmask 80896  }
   0x2   :  { %v643_v2 = vpack.c.bf16 %v40_v1, %v39_v0  ;;  %v23_v3 = vld [vmem:[%s1163_s1] sm:$0xff]  ;;  %v24_v4 = vld [vmem:[%s1163_s1 + $0x8] sm:$0xff]  ;;  %v42_v13 = vld [vmem:[%s1163_s1 + $0x98] sm:$0xff] }
   0x3   :  { %v71_v5 = vld [vmem:[%s1163_s1 + $0x180] sm:$0xff]  ;;  %v645_v6 = vpack.c.bf16 %v24_v4, %v23_v3  ;;  %v72_v7 = vld [vmem:[%s1163_s1 + $0x188] sm:$0xff]  ;;  %v25_v14 = vld [vmem:[%s1163_s1 + $0x10] sm:$0xff]  ;;  %v647_v15 = vpack.c.bf16 %v42_v13, %v41_v12  ;;  %v144_v3 = vshrl.u32 %v143_v53, 7 }
   0x4   :  { %v55_v8 = vld [vmem:[%s1163_s1 + $0x100] sm:$0xff]  ;;  %v56_v9 = vld [vmem:[%s1163_s1 + $0x108] sm:$0xff]  ;;  %644 = vmatprep.subr.bf16.mxu0 %v643_v2  ;;  %v675_v10 = vpack.c.bf16 %v72_v7, %v71_v5  ;;  %v26_v16 = vld [vmem:[%s1163_s1 + $0x18] sm:$0xff]  ;;  %v142_v2 = vunpack.c.0.s8 %v141_v52 }
   0x5   :  { %v677_v11 = vpack.c.bf16 %v56_v9, %v55_v8  ;;  %646 = vmatpush3.bf16.msra.mxu0 %v645_v6  ;;  %v73_v17 = vld [vmem:[%s1163_s1 + $0x190] sm:$0xff]  ;;  %v74_v18 = vld [vmem:[%s1163_s1 + $0x198] sm:$0xff]  ;;  %v649_v19 = vpack.c.bf16 %v26_v16, %v25_v14  ;;  %v43_v23 = vld [vmem:[%s1163_s1 + $0xa0] sm:$0xff] }
   0x6   :  { %676 = vmatprep.subr.bf16.mxu1 %v675_v10  ;;  %v679_v20 = vpack.c.bf16 %v74_v18, %v73_v17  ;;  %v57_v21 = vld [vmem:[%s1163_s1 + $0x110] sm:$0xff]  ;;  %v58_v22 = vld [vmem:[%s1163_s1 + $0x118] sm:$0xff]  ;;  %648 = vmatprep.subr.bf16.mxu0 %v647_v15  ;;  %v44_v25 = vld [vmem:[%s1163_s1 + $0xa8] sm:$0xff] }
   0x7   :  { %678 = vmatpush3.bf16.msra.mxu1 %v677_v11  ;;  %v681_v24 = vpack.c.bf16 %v58_v22, %v57_v21  ;;  %v27_v26 = vld [vmem:[%s1163_s1 + $0x20] sm:$0xff]  ;;  %v28_v27 = vld [vmem:[%s1163_s1 + $0x28] sm:$0xff]  ;;  %v651_v28 = vpack.c.bf16 %v44_v25, %v43_v23  ;;  %v45_v35 = vld [vmem:[%s1163_s1 + $0xb0] sm:$0xff] }
   0x8   :  { %680 = vmatprep.subr.bf16.mxu1 %v679_v20  ;;  %v75_v29 = vld [vmem:[%s1163_s1 + $0x1a0] sm:$0xff]  ;;  %v76_v30 = vld [vmem:[%s1163_s1 + $0x1a8] sm:$0xff]  ;;  %v653_v32 = vpack.c.bf16 %v28_v27, %v27_v26  ;;  %v46_v36 = vld [vmem:[%s1163_s1 + $0xb8] sm:$0xff]  ;;  %v984_v20 = vsub.s32 %v142_v2, %v144_v3 }
   0x9   :  { %v59_v31 = vld [vmem:[%s1163_s1 + $0x120] sm:$0xff]  ;;  %650 = vmatpush3.bf16.msra.mxu0 %v649_v19  ;;  %v683_v33 = vpack.c.bf16 %v76_v30, %v75_v29  ;;  %v60_v34 = vld [vmem:[%s1163_s1 + $0x128] sm:$0xff]  ;;  %v655_v37 = vpack.c.bf16 %v46_v36, %v45_v35  ;;  %v29_v38 = vld [vmem:[%s1163_s1 + $0x30] sm:$0xff] }
   0xa   :  { %652 = vmatprep.subr.bf16.mxu0 %v651_v28  ;;  %v30_v39 = vld [vmem:[%s1163_s1 + $0x38] sm:$0xff]  ;;  %v77_v40 = vld [vmem:[%s1163_s1 + $0x1b0] sm:$0xff]  ;;  %v685_v41 = vpack.c.bf16 %v60_v34, %v59_v31  ;;  %v47_v46 = vld [vmem:[%s1163_s1 + $0xc0] sm:$0xff] }
   0xb   :  { %682 = vmatpush3.bf16.msra.mxu1 %v681_v24  ;;  %v78_v42 = vld [vmem:[%s1163_s1 + $0x1b8] sm:$0xff]  ;;  %v61_v43 = vld [vmem:[%s1163_s1 + $0x130] sm:$0xff]  ;;  %v48_v47 = vld [vmem:[%s1163_s1 + $0xc8] sm:$0xff]  ;;  %v657_v48 = vpack.c.bf16 %v30_v39, %v29_v38 }
   0xc   :  { %684 = vmatprep.subr.bf16.mxu1 %v683_v33  ;;  %v687_v44 = vpack.c.bf16 %v78_v42, %v77_v40  ;;  %v62_v45 = vld [vmem:[%s1163_s1 + $0x138] sm:$0xff]  ;;  %v79_v49 = vld [vmem:[%s1163_s1 + $0x1c0] sm:$0xff]  ;;  %v80_v50 = vld [vmem:[%s1163_s1 + $0x1c8] sm:$0xff]  ;;  %v659_v54 = vpack.c.bf16 %v48_v47, %v47_v46 }
   0xd   :  { %654 = vmatpush3.bf16.msra.mxu0 %v653_v32  ;;  %v31_v55 = vld [vmem:[%s1163_s1 + $0x40] sm:$0xff]  ;;  %v32_v56 = vld [vmem:[%s1163_s1 + $0x48] sm:$0xff]  ;;  %v689_v57 = vpack.c.bf16 %v62_v45, %v61_v43  ;;  %v49_v58 = vld [vmem:[%s1163_s1 + $0xd0] sm:$0xff]  ;;  %v691_v60 = vpack.c.bf16 %v80_v50, %v79_v49 }
   0xe   :  { %656 = vmatprep.subr.bf16.mxu0 %v655_v37  ;;  %v50_v59 = vld [vmem:[%s1163_s1 + $0xd8] sm:$0xff]  ;;  %v63_v61 = vld [vmem:[%s1163_s1 + $0x140] sm:$0xff]  ;;  %v64_v62 = vld [vmem:[%s1163_s1 + $0x148] sm:$0xff]  ;;  %v661_v63 = vpack.c.bf16 %v32_v56, %v31_v55 }
   0xf   :  { %686 = vmatpush3.bf16.msra.mxu1 %v685_v41  ;;  %v81_v0 = vld [vmem:[%s1163_s1 + $0x1d0] sm:$0xff]  ;;  %v82_v1 = vld [vmem:[%s1163_s1 + $0x1d8] sm:$0xff]  ;;  %v663_v4 = vpack.c.bf16 %v50_v59, %v49_v58  ;;  %v693_v8 = vpack.c.bf16 %v64_v62, %v63_v61  ;;  %v51_v10 = vld [vmem:[%s1163_s1 + $0xe0] sm:$0xff] }
  0x10   :  { %688 = vmatprep.subr.bf16.mxu1 %v687_v44  ;;  %v33_v5 = vld [vmem:[%s1163_s1 + $0x50] sm:$0xff]  ;;  %v34_v6 = vld [vmem:[%s1163_s1 + $0x58] sm:$0xff]  ;;  %v52_v11 = vld [vmem:[%s1163_s1 + $0xe8] sm:$0xff]  ;;  %v695_v12 = vpack.c.bf16 %v82_v1, %v81_v0  ;;  %v790_v1 = vmov 0.0|0.0  }
  0x11   :  { %658 = vmatpush3.bf16.msra.mxu0 %v657_v48  ;;  %v65_v7 = vld [vmem:[%s1163_s1 + $0x150] sm:$0xff]  ;;  %v66_v9 = vld [vmem:[%s1163_s1 + $0x158] sm:$0xff]  ;;  %v35_v13 = vld [vmem:[%s1163_s1 + $0x60] sm:$0xff]  ;;  %v665_v16 = vpack.c.bf16 %v34_v6, %v33_v5  ;;  %v667_v21 = vpack.c.bf16 %v52_v11, %v51_v10 }
  0x12   :  { %660 = vmatprep.subr.bf16.mxu0 %v659_v54  ;;  %v36_v14 = vld [vmem:[%s1163_s1 + $0x68] sm:$0xff]  ;;  %v83_v15 = vld [vmem:[%s1163_s1 + $0x1e0] sm:$0xff]  ;;  %v53_v18 = vld [vmem:[%s1163_s1 + $0xf0] sm:$0xff]  ;;  %v697_v22 = vpack.c.bf16 %v66_v9, %v65_v7 }
  0x13   :  { %690 = vmatpush3.bf16.msra.mxu1 %v689_v57  ;;  %v84_v17 = vld [vmem:[%s1163_s1 + $0x1e8] sm:$0xff]  ;;  %v54_v19 = vld [vmem:[%s1163_s1 + $0xf8] sm:$0xff]  ;;  %v67_v26 = vld [vmem:[%s1163_s1 + $0x160] sm:$0xff]  ;;  %v669_v29 = vpack.c.bf16 %v36_v14, %v35_v13  ;;  %v792_v14 = vmov 0.0  }
  0x14   :  { %692 = vmatprep.subr.bf16.mxu1 %v691_v60  ;;  %v749_v23 = vld [vmem:[%s1162_s0] ss:$14 sps:$4 sm:$0xff]   ;;  %v751_v24 = vld [vmem:[%s1162_s0 + $0x1c] ss:$14 sps:$4 sm:$0xff]   ;;  %v699_v25 = vpack.c.bf16 %v84_v17, %v83_v15  ;;  %v753_v33 = vld [vmem:[%s1162_s0 + $0x4] ss:$14 sps:$4 sm:$0xff]   ;;  %v671_v35 = vpack.c.bf16 %v54_v19, %v53_v18 }
  0x15   :  { %662 = vmatpush3.bf16.msra.mxu0 %v661_v63  ;;  %v68_v27 = vld [vmem:[%s1163_s1 + $0x168] sm:$0xff]  ;;  %v85_v28 = vld [vmem:[%s1163_s1 + $0x1f0] sm:$0xff]  ;;  %v86_v30 = vld [vmem:[%s1163_s1 + $0x1f8] sm:$0xff]  ;;  %v146_v31 = vrot.slane %v749_v23, %v984_v20  ;;  %v160_v32 = vrot.slane %v751_v24, %v984_v20  ;;  %v153_v42 = vrot.slane %v753_v33, %v984_v20 }
  0x16   :  { %664 = vmatprep.subr.bf16.mxu0 %v663_v4  ;;  %v754_v34 = vld [vmem:[%s1162_s0 + $0x20] ss:$14 sps:$4 sm:$0xff]   ;;  %v38_v37 = vld [vmem:[%s1163_s1 + $0x78] sm:$0xff]  ;;  %v701_v38 = vpack.c.bf16 %v68_v27, %v67_v26  ;;  %v703_v44 = vpack.c.bf16 %v86_v30, %v85_v28  ;;  %v758_v5 = vld [vmem:[%s1162_s0 + $0x24] ss:$14 sps:$4 sm:$0xff]  }
  0x17   :  { %694 = vmatpush3.bf16.msra.mxu1 %v693_v8  ;;  %v37_v36 = vld [vmem:[%s1163_s1 + $0x70] sm:$0xff]  ;;  %v169_v39 = vcombine.high %v146_v31, %v160_v32  ;;  %v103_v40 = vld [vmem:[%s1163_s1 + $0x280] sm:$0xff]  ;;  %v104_v41 = vld [vmem:[%s1163_s1 + $0x288] sm:$0xff]  ;;  %v167_v43 = vrot.slane %v754_v34, %v984_v20  ;;  %v168_v55 = vcombine.low %v146_v31, %v160_v32  ;;  %v196_v11 = vrot.slane %v758_v5, %v984_v20 }
  0x18   :  { %696 = vmatprep.subr.bf16.mxu1 %v695_v12  ;;  %v69_v45 = vld [vmem:[%s1163_s1 + $0x170] sm:$0xff]  ;;  %v70_v46 = vld [vmem:[%s1163_s1 + $0x178] sm:$0xff]  ;;  %v673_v47 = vpack.c.bf16 %v38_v37, %v37_v36  ;;  %v707_v49 = vpack.c.bf16 %v104_v41, %v103_v40  ;;  %v87_v50 = vld [vmem:[%s1163_s1 + $0x200] sm:$0xff] }
  0x19   :  { %666 = vmatpush3.bf16.msra.mxu0 %v665_v16  ;;  %280 = vmatprep.mubr.f32.mxu0 %v169_v39  ;;  %v171_v48 = vcombine.high %v153_v42, %v167_v43  ;;  %v88_v51 = vld [vmem:[%s1163_s1 + $0x208] sm:$0xff]  ;;  %v705_v52 = vpack.c.bf16 %v70_v46, %v69_v45  ;;  %v105_v53 = vld [vmem:[%s1163_s1 + $0x290] sm:$0xff]  ;;  %v106_v54 = vld [vmem:[%s1163_s1 + $0x298] sm:$0xff]  ;;  %v170_v57 = vcombine.low %v153_v42, %v167_v43 }
  0x1a   :  { %668 = vmatprep.subr.bf16.mxu0 %v667_v21  ;;  %v709_v56 = vpack.c.bf16 %v88_v51, %v87_v50  ;;  %v711_v58 = vpack.c.bf16 %v106_v54, %v105_v53  ;;  %v89_v59 = vld [vmem:[%s1163_s1 + $0x210] sm:$0xff]  ;;  %v90_v60 = vld [vmem:[%s1163_s1 + $0x218] sm:$0xff]  ;;  %v107_v61 = vld [vmem:[%s1163_s1 + $0x2a0] sm:$0xff] }
  0x1b   :  { %698 = vmatpush3.bf16.msra.mxu1 %v697_v22  ;;  %350 = vmatprep.mubr.f32.mxu1 %v171_v48  ;;  %v108_v62 = vld [vmem:[%s1163_s1 + $0x2a8] sm:$0xff]  ;;  %v91_v63 = vld [vmem:[%s1163_s1 + $0x220] sm:$0xff]  ;;  %v713_v2 = vpack.c.bf16 %v90_v60, %v89_v59  ;;  %v109_v3 = vld [vmem:[%s1163_s1 + $0x2b0] sm:$0xff] }
  0x1c   :  { %700 = vmatprep.subr.bf16.mxu1 %v699_v25  ;;  %v92_v0 = vld [vmem:[%s1163_s1 + $0x228] sm:$0xff]  ;;  %v715_v6 = vpack.c.bf16 %v108_v62, %v107_v61  ;;  %v110_v9 = vld [vmem:[%s1163_s1 + $0x2b8] sm:$0xff]  ;;  %v119_v12 = vld [vmem:[%s1163_s1 + $0x300] sm:$0xff] }
  0x1d   :  { %670 = vmatpush3.bf16.msra.mxu0 %v669_v29  ;;  %v755_v4 = vld [vmem:[%s1162_s0 + $0x8] ss:$14 sps:$4 sm:$0xff]   ;;  %v757_v7 = vld [vmem:[%s1162_s0 + $0xc] ss:$14 sps:$4 sm:$0x33]   ;;  %v717_v18 = vpack.c.bf16 %v92_v0, %v91_v63  ;;  %v719_v21 = vpack.c.bf16 %v110_v9, %v109_v3  ;;  %v95_v28 = vld [vmem:[%s1163_s1 + $0x240] sm:$0xff] }
  0x1e   :  { %672 = vmatprep.subr.bf16.mxu0 %v671_v35  ;;  %v760_v8 = vld [vmem:[%s1162_s0 + $0x28] ss:$14 sps:$4 sm:$0x33]   ;;  %v182_v10 = vrot.slane %v755_v4, %v984_v20  ;;  %v189_v15 = vrot.slane %v757_v7, %v984_v20  ;;  %v94_v23 = vld [vmem:[%s1163_s1 + $0x238] sm:$0xff]  ;;  %v115_v36 = vld [vmem:[%s1163_s1 + $0x2e0] sm:$0xff] }
  0x1f   :  { %702 = vmatpush3.bf16.msra.mxu1 %v701_v38  ;;  %v120_v13 = vld [vmem:[%s1163_s1 + $0x308] sm:$0xff]  ;;  %v203_v16 = vrot.slane %v760_v8, %v984_v20  ;;  %v93_v22 = vld [vmem:[%s1163_s1 + $0x230] sm:$0xff]  ;;  %v111_v20 = vld [vmem:[%s1163_s1 + $0x2c0] sm:$0xff] }
  0x20   :  { %704 = vmatprep.subr.bf16.mxu1 %v703_v44  ;;  %v740_v17 = vpack.c.bf16 %v120_v13, %v119_v12  ;;  %v205_v19 = vcombine.high %v182_v10, %v196_v11  ;;  %v112_v25 = vld [vmem:[%s1163_s1 + $0x2c8] sm:$0xff]  ;;  %v721_v26 = vpack.c.bf16 %v94_v23, %v93_v22  ;;  %v113_v30 = vld [vmem:[%s1163_s1 + $0x2d0] sm:$0xff]  ;;  %v114_v31 = vld [vmem:[%s1163_s1 + $0x2d8] sm:$0xff] }
  0x21   :  { %674 = vmatpush3.bf16.msra.mxu0 %v673_v47  ;;  %v206_v24 = vcombine.low %v189_v15, %v203_v16  ;;  %v723_v27 = vpack.c.bf16 %v112_v25, %v111_v20  ;;  %v96_v29 = vld [vmem:[%s1163_s1 + $0x248] sm:$0xff]  ;;  %v727_v33 = vpack.c.bf16 %v114_v31, %v113_v30  ;;  %v97_v34 = vld [vmem:[%s1163_s1 + $0x250] sm:$0xff]  ;;  %v98_v35 = vld [vmem:[%s1163_s1 + $0x258] sm:$0xff] }
  0x22   :  { %708 = vmatprep.subr.bf16.mxu0 %v707_v49  ;;  %v725_v32 = vpack.c.bf16 %v96_v29, %v95_v28  ;;  %v116_v37 = vld [vmem:[%s1163_s1 + $0x2e8] sm:$0xff]  ;;  %v729_v38 = vpack.c.bf16 %v98_v35, %v97_v34  ;;  %v99_v40 = vld [vmem:[%s1163_s1 + $0x260] sm:$0xff]  ;;  %v117_v42 = vld [vmem:[%s1163_s1 + $0x2f0] sm:$0xff]  ;;  %v204_v49 = vcombine.low %v182_v10, %v196_v11 }
  0x23   :  { %706 = vmatpush3.bf16.msra.mxu1 %v705_v52  ;;  %v731_v39 = vpack.c.bf16 %v116_v37, %v115_v36  ;;  %v100_v41 = vld [vmem:[%s1163_s1 + $0x268] sm:$0xff]  ;;  %v118_v43 = vld [vmem:[%s1163_s1 + $0x2f8] sm:$0xff]  ;;  %v101_v46 = vld [vmem:[%s1163_s1 + $0x270] sm:$0xff] }
  0x24   :  { %281 = vmatmul.mubr.f32.vlgmr.msra.gmra.mrb[0].mxu0 %v168_v55  ;;  %739 = vmatprep.subr.bf16.mxu1 %v790_v1  ;;  %v733_v44 = vpack.c.bf16 %v100_v41, %v99_v40  ;;  %v735_v45 = vpack.c.bf16 %v118_v43, %v117_v42  ;;  %v102_v47 = vld [vmem:[%s1163_s1 + $0x278] sm:$0xff]  ;;  %v526_v51 = vld [vmem:[%s1164_s2] ss:$0 sm:$0xff] }
  0x25   :  { %710 = vmatpush3.bf16.msra.mxu0 %v709_v56  ;;  %420 = vmatprep.mubr.f32.mxu0 %v205_v19  ;;  %v737_v48 = vpack.c.bf16 %v102_v47, %v101_v46 }
  0x26   :  { %351 = vmatmul.mubr.f32.vlgmr.msra.gmra.mrb[0].mxu1 %v170_v57  ;;  %712 = vmatprep.subr.bf16.mxu0 %v711_v58 }
  0x27   :  { %640 = vmatprep.mubr.msk.f32.mxu1 %vm791_vm0, %v792_v14  ;;  %741 = vmatpush3.bf16.msra.mxu1 %v740_v17 }
  0x29   :  { %714 = vmatpush3.bf16.msra.mxu0 %v713_v2 }
  0x2a   :  { %716 = vmatprep.subr.bf16.mxu0 %v715_v6  ;;  %641 = vmatmul.mubr.msk.f32.vlgmr.msra.gmra.mrb[2].mxu1 %vm213_vm1, %v206_v24 }
  0x2d   :  { %718 = vmatpush3.bf16.msra.mxu0 %v717_v18 }
  0x2e   :  { %720 = vmatprep.subr.bf16.mxu0 %v719_v21 }
  0x31   :  { %722 = vmatpush3.bf16.msra.mxu0 %v721_v26 }
  0x32   :  { %724 = vmatprep.subr.bf16.mxu0 %v723_v27 }
  0x35   :  { %726 = vmatpush3.bf16.msra.mxu0 %v725_v32 }
  0x36   :  { %728 = vmatprep.subr.bf16.mxu0 %v727_v33 }
  0x39   :  { %730 = vmatpush3.bf16.msra.mxu0 %v729_v38 }
  0x3a   :  { %732 = vmatprep.subr.bf16.mxu0 %v731_v39 }
  0x3d   :  { %734 = vmatpush3.bf16.msra.mxu0 %v733_v44 }
  0x3e   :  { %736 = vmatprep.subr.bf16.mxu0 %v735_v45 }
  0x41   :  { %738 = vmatpush3.bf16.msra.mxu0 %v737_v48 }
  0x44   :  { %421 = vmatmul.mubr.f32.vlgmr.msra.gmra.mrb[2].mxu0 %v204_v49 }
  0xf7   :  { %v560_v50 = vpop.f32.mrb[0].mxu0 }
  0xf8   :  { %v561_v52 = vpop.f32.mrb[1].mxu0 }
  0xf9   :  { %v562_v53 = vadd.f32 %v561_v52, %v560_v50  ;;  %v595_v54 = vpop.f32.mrb[0].mxu1 }
  0xfa   :  { %v596_v55 = vpop.f32.mrb[1].mxu1 }
  0xfb   :  { %v283_v56 = vadd.f32 %v562_v53, %v526_v51  ;;  %v597_v57 = vadd.f32 %v596_v55, %v595_v54 }
  0xfd   :  { %v353_v58 = vadd.f32 %v597_v57, %v283_v56  ;;  %v492_v59 = vpop.f32.mrb[2].mxu1 }
  0xfe   :  { %v642_v60 = vpop.f32.mrb[3].mxu1 }
 0x117   :  { %v630_v61 = vpop.f32.mrb[2].mxu0 }
 0x118   :  { %v631_v62 = vpop.f32.mrb[3].mxu0 }
 0x119   :  { %v632_v63 = vadd.f32 %v631_v62, %v630_v61 }
 0x11b   :  { %v423_v0 = vadd.f32 %v632_v63, %v353_v58 }
 0x11d   :  { %v493_v1 = vadd.f32 %v492_v59, %v423_v0 }
 0x11f   :  { %v497_v2 = vsel %vm496_vm2, %v493_v1, -inf }
 0x120   :  { %498 = vmax.xlane.f32.xlu0 %v497_v2 }
 0x1ad   :  { %v499_v3 = vpop.xlane.xlu0 %498 }
 0x1ae   :  { %v500_v4 = vsub.f32 %v493_v1, %v499_v3 }
 0x1b0   :  { %v501_v5 = vmul.f32 1.442695, %v500_v4 }
 0x1b2   :  { %761 = vpow2.f32 %v501_v5 }
 0x1bc   :  { %v762_v6 = vpop.eup %761 }
 0x1bd   :  { %v503_v7 = vsel %vm496_vm2, %v762_v6, 0.0 }
 0x1be   :  { %504 = vadd.xlane.f32.xlu0 %v503_v7 }
 0x24b   :  { %v505_v8 = vpop.xlane.xlu0 %504 }
 0x24c   :  { %763 = vlog2.f32 %v505_v8 }
 0x256   :  { %v764_v9 = vpop.eup %763 }
 0x257   :  { %v507_v10 = vmul.f32 0.6931472, %v764_v9 }
 0x259   :  { %v508_v11 = vsub.f32 %v500_v4, %v507_v10 }
 0x25b   :  { %509 = vst.msk [vmem:[#allocation2] sm:$0xff] %vm496_vm2, %v508_v11 }
 0x25c   :  { %514 = vsyncadd [#allocation3], 96  ;;  %s793_s1 = smov [#allocation2]  }
 0x25d   :  { %s515_s2 = sshll.u32 %s793_s1, 4  ;;  %s516_s2 = int_to_ptr.vmem [resolvable:$true] %s515_s2 }
 0x25e   :  { %s765_s8 = scalar_lea.vmem %s516_s2, 32  ;;  %s769_s9 = scalar_lea.vmem %s516_s2, 128 }
 0x25f   :  { %p766_p0 = scmp.ne.s32.totalorder %s516_s2, %s765_s8  ;;  %p770_p1 = scmp.lt.s32.totalorder %s516_s2, %s516_s2 }
 0x260   :  { %p771_p2 = scmp.lt.s32.totalorder %s769_s9, %s765_s8 }
 0x262   :  { %p772_p3 = por %p771_p2, %p770_p1 }
 0x264   :  { %p773_p4 = pnand %p772_p3, %p766_p0 }
 0x266   :  { %776 = shalt.err (!%p773_p4)
}
 0x267   :  { %s777_s12 = scalar_lea.hbm %s1165_s3, 32 }
 0x268   :  { %p778_p5 = scmp.ne.s32.totalorder %s1165_s3, %s777_s12  ;;  %p781_p6 = scmp.lt.u32.totalorder %s777_s12, %s1165_s3 }
 0x26a   :  { %p783_p7 = pnand %p781_p6, %p778_p5 }
 0x26c   :  { %786 = shalt.err (!%p783_p7)
}
 0x26d   :  { %s794_s17 = smov 32   ;;  %s795_s18 = smov 2  }
 0x26e   :  { %521 = dma.vmem_to_hbm [thread:$0]  %s516_s2, 32, %s1165_s3, [#allocation3], %s794_s17, %s794_s17, %s795_s18  }
 0x26f   :  { %787 = dma.done.wait [#allocation3], 128  }
 0x270   :  { %788 = vsyncadd [#allocation3], 4294967168 }
 0x271   :  { %525 = vsyncpa [#allocation3], 1 }

</bundles_post_ra>
